<compile_context>
chip_gen: v6e
topology: v6e:2x2x1
jax: 0.10.0
libtpu: 0.0.40
codegen_flags: <defaults>
</compile_context>

<pallas_src>
import jax
import jax.numpy as jnp
from jax.experimental import pallas as pl
from jax.experimental.pallas import tpu as pltpu

_BLOCK_BUDGET_BYTES = 2 * 1024 * 1024   # padded input bytes per grid-step block
_MIN_GRID_STEPS = 8                     # >= 4 pipelined steps per TC on v7x


def _round_up(x, m):
    return (x + m - 1) // m * m


def _padded_plane_bytes(h, w, itemsize):
    # Conservative (8,128)-tile padding estimate; 4 B/elt floor because the
    # in-kernel temporaries are f32 regardless of I/O dtype.
    return _round_up(h, 8) * _round_up(w, 128) * max(itemsize, 4)


def _laplacian_kernel(x_ref, o_ref):
    """Valid-region Laplacian [[0,1,0],[1,-4,1],[0,1,0]] via shifted slices."""
    ho = o_ref.shape[1]
    wo = o_ref.shape[2]
    x = x_ref[...].astype(jnp.float32)          # f32 accumulation (v5e-safe)
    acc = x[:, 0:ho, 1:wo + 1]                  # up     x[r-1, c]
    acc = acc + x[:, 2:ho + 2, 1:wo + 1]        # down   x[r+1, c]
    acc = acc + x[:, 1:ho + 1, 0:wo]            # left   x[r, c-1]
    acc = acc + x[:, 1:ho + 1, 2:wo + 2]        # right  x[r, c+1]
    acc = acc - 4.0 * x[:, 1:ho + 1, 1:wo + 1]  # center tap
    o_ref[...] = acc.astype(o_ref.dtype)


def _choose_tb(nc, padded_plane_bytes):
    """Planes per grid step: fill the block budget, then deepen the pipeline."""
    cap = max(1, _BLOCK_BUDGET_BYTES // padded_plane_bytes)
    tb = min(nc, cap)
    while nc % tb:
        tb -= 1
    # Aim for >= _MIN_GRID_STEPS steps and an even step count so v7x's two
    # TensorCores stay balanced and each gets steady-state double-buffering.
    target = min(_MIN_GRID_STEPS, nc)
    while tb > 1 and ((nc // tb) < target or (nc // tb) % 2):
        tb -= 1
        while nc % tb:
            tb -= 1
    return tb


def gradient_map(x):
    """Depthwise 3x3 Laplacian conv (valid padding), matching gradient_feature512.

    x: (N, C, H, W) float -> (N, C, H-2, W-2)
    """
    N, C, H, W = x.shape
    if H < 3 or W < 3:
        raise ValueError("spatial dims must be >= 3 for a valid 3x3 conv")
    nc = N * C
    Ho, Wo = H - 2, W - 2
    itemsize = x.dtype.itemsize

    in_plane = _padded_plane_bytes(H, W, itemsize)
    out_plane = _padded_plane_bytes(Ho, Wo, itemsize)
    tb = _choose_tb(nc, in_plane)

    # 2x double-buffered in/out blocks + ~3 block-sized f32 temporaries.
    working_set = tb * (2 * in_plane + 2 * out_plane + 3 * in_plane)
    vmem_limit = int(min(56 << 20, max(32 << 20, working_set + (8 << 20))))

    # Accurate now: no wrapper transposes/slices, stores are valid-region only.
    cost = pl.CostEstimate(
        flops=6 * nc * Ho * Wo,
        transcendentals=0,
        bytes_accessed=nc * (H * W + Ho * Wo) * itemsize,
    )

    x_flat = x.reshape(nc, H, W)          # free: contiguous leading-dim merge
    out = pl.pallas_call(
        _laplacian_kernel,
        out_shape=jax.ShapeDtypeStruct((nc, Ho, Wo), x.dtype),
        grid_spec=pltpu.PrefetchScalarGridSpec(
            num_scalar_prefetch=0,
            grid=(nc // tb,),
            in_specs=[pl.BlockSpec((tb, H, W), lambda i: (i, 0, 0))],
            out_specs=pl.BlockSpec((tb, Ho, Wo), lambda i: (i, 0, 0)),
        ),
        compiler_params=pltpu.CompilerParams(
            dimension_semantics=("parallel",),
            vmem_limit_bytes=vmem_limit,
        ),
        cost_estimate=cost,
    )(x_flat)
    return out.reshape(N, C, Ho, Wo)      # free: contiguous leading-dim split


def gradient_map_ref(x):
    """Pure-JAX reference: 3x3 depthwise conv with [[0,1,0],[1,-4,1],[0,1,0]]."""
    up = x[..., :-2, 1:-1]
    down = x[..., 2:, 1:-1]
    left = x[..., 1:-1, :-2]
    right = x[..., 1:-1, 2:]
    center = x[..., 1:-1, 1:-1]
    return up + down + left + right - 4.0 * center


if __name__ == "__main__":
    key = jax.random.PRNGKey(0)
    k1, k2 = jax.random.split(key)

    # Small shape consistent with the module interface (batch=2, channels=4, 16x16).
    x1 = jax.random.normal(k1, (2, 4, 16, 16), dtype=jnp.float32)
    out1 = jax.block_until_ready(gradient_map(x1))
    ref1 = gradient_map_ref(x1)
    assert out1.shape == (2, 4, 14, 14)
    assert jnp.allclose(out1, ref1, atol=1e-5, rtol=1e-5)

    # Many-channel case: exercises multi-plane blocks and the >=8-step grid.
    x2 = jax.random.normal(k2, (1, 256, 8, 8), dtype=jnp.float32)
    out2 = jax.block_until_ready(gradient_map(x2))
    ref2 = gradient_map_ref(x2)
    assert out2.shape == (1, 256, 6, 6)
    assert jnp.allclose(out2, ref2, atol=1e-5, rtol=1e-5)

    print("KERNEL_OK")
</pallas_src>

<mosaic_0001>
module attributes {stable_mosaic.version = 11 : i64} {
  func.func @_laplacian_kernel(%arg0: i32, %arg1: memref<1x16x16xf32, #tpu.memory_space<vmem>>, %arg2: memref<1x14x14xf32, #tpu.memory_space<vmem>>) attributes {dimension_semantics = [#tpu.dimension_semantics<parallel>], iteration_bounds = array<i64: 8>, scalar_prefetch = 0 : i64, scratch_operands = 0 : i64, tpu.core_type = #tpu.core_type<tc>, window_params = [{transform_indices = @transform_0, window_bounds = array<i64: 1, 16, 16>}, {transform_indices = @transform_1, window_bounds = array<i64: 1, 14, 14>}]} {
    %c0 = arith.constant 0 : index
    %c0_0 = arith.constant 0 : index
    %c0_1 = arith.constant 0 : index
    %0 = vector.load %arg1[%c0, %c0_0, %c0_1] : memref<1x16x16xf32, #tpu.memory_space<vmem>>, vector<1x16x16xf32>
    %1 = vector.extract_strided_slice %0 {offsets = [0, 0, 1], sizes = [1, 14, 14], strides = [1, 1, 1]} : vector<1x16x16xf32> to vector<1x14x14xf32>
    %2 = vector.extract_strided_slice %0 {offsets = [0, 2, 1], sizes = [1, 14, 14], strides = [1, 1, 1]} : vector<1x16x16xf32> to vector<1x14x14xf32>
    %3 = arith.addf %1, %2 : vector<1x14x14xf32>
    %4 = vector.extract_strided_slice %0 {offsets = [0, 1, 0], sizes = [1, 14, 14], strides = [1, 1, 1]} : vector<1x16x16xf32> to vector<1x14x14xf32>
    %5 = arith.addf %3, %4 : vector<1x14x14xf32>
    %6 = vector.extract_strided_slice %0 {offsets = [0, 1, 2], sizes = [1, 14, 14], strides = [1, 1, 1]} : vector<1x16x16xf32> to vector<1x14x14xf32>
    %7 = arith.addf %5, %6 : vector<1x14x14xf32>
    %8 = vector.extract_strided_slice %0 {offsets = [0, 1, 1], sizes = [1, 14, 14], strides = [1, 1, 1]} : vector<1x16x16xf32> to vector<1x14x14xf32>
    %cst = arith.constant 4.000000e+00 : f32
    %9 = vector.broadcast %cst : f32 to vector<1x14x14xf32>
    %10 = arith.mulf %9, %8 : vector<1x14x14xf32>
    %11 = arith.subf %7, %10 : vector<1x14x14xf32>
    %c0_2 = arith.constant 0 : index
    %c0_3 = arith.constant 0 : index
    %c0_4 = arith.constant 0 : index
    %12 = vector.load %arg2[%c0_2, %c0_3, %c0_4] : memref<1x14x14xf32, #tpu.memory_space<vmem>>, vector<1x14x14xf32>
    tpu.vector_store %arg2[%c0_2, %c0_3, %c0_4], %11 {strides = array<i32>} : memref<1x14x14xf32, #tpu.memory_space<vmem>>, vector<1x14x14xf32>,
    return
  }
  func.func @transform_0(%arg0: i32) -> (i32, i32, i32) {
    %c0_i32 = arith.constant 0 : i32
    %c0_i32_0 = arith.constant 0 : i32
    %c0_i32_1 = arith.constant 0 : i32
    return %arg0, %c0_i32, %c0_i32_0 : i32, i32, i32
  }
  func.func @transform_1(%arg0: i32) -> (i32, i32, i32) {
    %c0_i32 = arith.constant 0 : i32
    %c0_i32_0 = arith.constant 0 : i32
    %c0_i32_1 = arith.constant 0 : i32
    return %arg0, %c0_i32, %c0_i32_0 : i32, i32, i32
  }
}

</mosaic_0001>

<bundles_post_ra>
// kernel: tpu_custom_call.1
= control target key start
LH: loop header
LB: loop body
LE: loop exit
PB: predicated region body
PF: predicated region fallthrough
CT: control target
= control target key end

     0   :  { %6 = vsyncpa [#allocation3], 0  ;;  %s498_s0 = inlined_call_operand.hbm [shape: f32[8,16,16], index: 0, kind: input, shape index: {}]   ;;  %s499_s1 = inlined_call_operand.vmem [shape: f32[8,14,14], index: 1, kind: output, shape index: {}]  }
   0x1   :  { %8 = vsyncpa [#allocation3 + $0x1], 0  ;;  %s395_s6 = smov 0   ;;  %s397_s7 = smov 0  }
   0x2   :  { %s399_s8 = smov 0   ;;  %s401_s9 = smov 0  }
   0x3 LB: > { %s414_s10 = sadd.s32 4294967295, %s378_s9   ;;  %s417_s11 = sadd.s32 1, %s378_s9   ;;  %s378_s9 = sphi %s401_s9, %s508_s9   ;;  %s374_s8 = sphi %s399_s8, %s507_s8   ;;  %s370_s7 = sphi %s397_s7, %s506_s7   ;;  %s366_s6 = sphi %s395_s6, %s505_s6  }
   0x4   : > { %s18_s12 = ssub.s32 %s378_s9, %s417_s11  ;;  %s21_s13 = sadd.s32 1, %s374_s8 }
   0x5   : > { %p19_p0 = scmp.eq.s32.totalorder %s18_s12, 0  ;;  %p28_p1 = scmp.ne.s32.totalorder %s374_s8, %s370_s7 }
   0x6   : > { %p29_p2 = scmp.eq.s32.totalorder %s378_s9, 0  ;;  %p34_p3 = scmp.ne.s32.totalorder %s370_s7, %s366_s6 }
   0x7   : > { %s427_s14 = scalar_select %p19_p0, %s374_s8, %s21_s13  }
   0x8   : > { %p30_p4 = por %p29_p2, %p28_p1  ;;  %p35_p5 = scmp.eq.s32.totalorder %s414_s10, 0 }
   0x9   : > { %p279_p6 = scmp.lt.s32.totalorder %s378_s9, 8  ;;  %s84_s16 = sand.u32 1, %s374_s8  }
   0xa   : > { %p431_p7 = por %p35_p5, %p34_p3  ;;  %s262_s17 = sshll.u32 %s84_s16, 4 }
   0xb   : > { %s271_s18 = sshll.u32 %s378_s9, 8  ;;  %s88_s22 = scalar_lea.vmem [#allocation2], %s262_s17 }
   0xc   : > { %s501_s15 = scalar_select %p431_p7, 1, 0 }
   0xd   : > { %s440_s21 = scalar_lea.hbm %s498_s0, %s271_s18  ;;  %s95_s23 = sshll.u32 %s88_s22, 4  ;;  %s442_s23 = int_to_ptr.vmem [resolvable:$true] %s95_s23 }
   0xe   : > { %p444_p8 = pnand %p279_p6, %p30_p4  ;;  %s449_s25 = scalar_lea.sflag [#allocation3], %s84_s16 }
   0xf   : > { %s316_s26 = scalar_lea.hbm %s440_s21, 256  ;;  %s321_s29 = scalar_lea.hbm %s498_s0, 2048 }
  0x10   : > { %p317_p10 = scmp.ne.s32.totalorder %s440_s21, %s316_s26  ;;  %p318_p11 = pneg %p444_p8 }
  0x11   : > { %p322_p0 = scmp.lt.s32.totalorder %s440_s21, %s498_s0  ;;  %p323_p1 = scmp.lt.s32.totalorder %s321_s29, %s316_s26 }
  0x12   : > { %p319_p12 = pnand %p318_p11, %p317_p10 }
  0x13   : > { %p324_p2 = por %p323_p1, %p322_p0 }
  0x14   : > { %p320_p13 = pneg %p319_p12 }
  0x16   : > { %p325_p3 = pnand %p324_p2, %p320_p13 }
  0x18   : > { %328 = shalt.err (!%p325_p3)
}
  0x19   : > { %s329_s3 = scalar_lea.vmem %s442_s23, 256  ;;  %s380_s4 = smov [#allocation2]  }
  0x1a   : > { %p330_p4 = scmp.ne.s32.totalorder %s442_s23, %s329_s3  ;;  %s334_s5 = sshll.u32 %s380_s4, 4  ;;  %s335_s5 = int_to_ptr.vmem [resolvable:$false] %s334_s5 }
  0x1b   : > { %s336_s6 = scalar_lea.vmem %s335_s5, 512  ;;  %p337_p10 = scmp.lt.s32.totalorder %s442_s23, %s335_s5 }
  0x1c   : > { %p332_p5 = pnand %p330_p4, %p318_p11  ;;  %p338_p12 = scmp.lt.s32.totalorder %s336_s6, %s329_s3 }
  0x1e   : > { %p333_p6 = pneg %p332_p5  ;;  %p339_p9 = por %p338_p12, %p337_p10 }
  0x20   : > { %p340_p7 = pnand %p339_p9, %p333_p6 }
  0x22   : > { %343 = shalt.err (!%p340_p7)
}
  0x23   : > { %s381_s12 = smov 128   ;;  %s382_s13 = smov 8  }
  0x24   : > { %278 = dma.hbm_to_vmem [thread:$0]  (!%p444_p8), %s440_s21, 256, %s442_s23, %s449_s25, %s381_s12, %s381_s12, %s382_s13  }
  0x25   : > { %p103_p11 = scmp.lt.s32.totalorder %s378_s9, 9  ;;  %p503_p13 = scmp.ge.s32.totalorder %s378_s9, 1 }
  0x27   : > { %p104_p0 = pnand %p503_p13, %p103_p11 }
  0x28   : > { %s109_s16 = sand.u32 (!%p104_p0), 1, %s370_s7   ;;  %p504_p7 = scmp.ne.s32.totalorder (!%p104_p0), %s501_s15, 0 }
  0x29   : > { %107 = sbr.rel (%p104_p0) target bundleno = 292 (0x124), region = 24  ;;  %s266_s17 = sshll.u32 (!%p104_p0), %s109_s16, 4 }
  0x2a   : > { %s110_s18 = scalar_lea.sflag (!%p104_p0), [#allocation3], %s109_s16  ;;  %s113_s19 = scalar_lea.vmem (!%p104_p0), [#allocation2], %s266_s17 }
  0x2e   : > { %361 = dma.done.wait (%p504_p7), %s110_s18, 256  }
  0x2f   : > { %363 = vsyncadd (%p504_p7), %s110_s18, 4294967040  ;;  %v137_v0 = vld [vmem:[%s113_s19] sm:$0xff]  ;;  %v138_v1 = vld [vmem:[%s113_s19 + $0x8] sm:$0xff]  ;;  %vm149_vm0 = vcmask 1046528   ;;  %vm141_vm1 = vcmask 1045504   ;;  %s383_s9 = smov 1  }
  0x30   : > { %v150_v2 = vrot.slane %v137_v0, 1  ;;  %v151_v3 = vrot.slane %v138_v1, 1  ;;  %v143_v4 = vrot.slane %v138_v1, 2  ;;  %v142_v5 = vrot.slane %v137_v0, 2  ;;  %s384_s20 = smov 127   ;;  %p132_p8 = scmp.lt.s32.totalorder %s414_s10, 7 }
  0x31   : > { %v169_v6 = vmul.f32 4.0, %v137_v0  ;;  %v170_v7 = vmul.f32 4.0, %v138_v1  ;;  %vm188_vm2 = vcmask 113664   ;;  %vm190_vm3 = vcmask 111616  }
  0x32   : > { %v152_v8 = vsel %vm149_vm0, %v150_v2, %v151_v3  ;;  %v144_v9 = vsel %vm141_vm1, %v142_v5, %v143_v4  ;;  %v148_v17 = vadd.f32 %v143_v4, %v138_v1  ;;  %s510_s10 = smov (!%p132_p8, %s414_s10), 7 }
  0x33   : > { %153 = vrot.lane.b32.xlu0 %v152_v8, %s383_s9  ;;  %161 = vrot.lane.b32.xlu1 %v152_v8, %s384_s20  ;;  %v147_v10 = vadd.f32 %v144_v9, %v137_v0  ;;  %v173_v11 = vrot.slane %v169_v6, 1  ;;  %v174_v12 = vrot.slane %v170_v7, 1  ;;  %s272_s15 = sshll.u32 %s510_s10, 4 }
  0x34   : > { %s136_s23 = scalar_lea.vmem %s499_s1, %s272_s15 }
  0x35   : > { %v175_v13 = vsel %vm149_vm0, %v173_v11, %v174_v12 }
  0x37   : > { %155 = vrot.lane.b32.xlu0 %v151_v3, %s383_s9  ;;  %163 = vrot.lane.b32.xlu1 %v151_v3, %s384_s20 }
  0xa5   : > { %v154_v14 = vpop.permute.xlu0 %153  ;;  %v162_v15 = vpop.permute.xlu1 %161 }
  0xa6   : > { %v159_v16 = vadd.f32 %v154_v14, %v147_v10 }
  0xa8   : > { %v167_v18 = vadd.f32 %v162_v15, %v159_v16 }
  0xa9   : > { %v156_v19 = vpop.permute.xlu0 %155  ;;  %v164_v20 = vpop.permute.xlu1 %163 }
  0xaa   : > { %v178_v21 = vsub.f32 %v167_v18, %v175_v13  ;;  %v160_v22 = vadd.f32 %v156_v19, %v148_v17 }
  0xac   : > { %v168_v23 = vadd.f32 %v164_v20, %v160_v22  ;;  %182 = vrot.lane.b32.xlu0 %v178_v21, %s384_s20 }
  0xae   : > { %v179_v24 = vsub.f32 %v168_v23, %v174_v12 }
  0xb0   : > { %184 = vrot.lane.b32.xlu1 %v179_v24, %s384_s20 }
 0x11e   : > { %v183_v25 = vpop.permute.xlu0 %182 }
 0x11f   : > { %189 = vst.msk [vmem:[%s136_s23] sm:$0xff] %vm188_vm2, %v183_v25 }
 0x122   : > { %v185_v26 = vpop.permute.xlu1 %184 }
 0x123   : > { %191 = vst.msk [vmem:[%s136_s23 + $0x8] sm:$0x3f] %vm190_vm3, %v185_v26 }
 0x124 PF: > { %p11_p9 = scmp.ge.s32.totalorder %s417_s11, 10   ;;  %s505_s6 = smov %s370_s7 }
 0x125   : > { %s506_s7 = smov %s374_s8  ;;  %s507_s8 = smov %s427_s14 }
 0x126   : > { %s508_s9 = smov %s417_s11  ;;  %13 = sbr.rel (!%p11_p9) target bundleno = 3 (0x3), region = 64 }
 0x12b   :  { %213 = vsyncpa [#allocation3], 1 }
 0x12c   :  { %215 = vsyncpa [#allocation3 + $0x1], 1 }

</bundles_post_ra>
